<compile_context>
chip_gen: v6e
topology: v6e:2x2x1
jax: 0.10.0
libtpu: 0.0.40
codegen_flags: <defaults>
</compile_context>

<pallas_src>
import jax
import jax.numpy as jnp
from jax.experimental import pallas as pl
from jax.experimental.pallas import tpu as pltpu


def _round_up(x, m):
    return ((x + m - 1) // m) * m


def _vmem_bytes(tile_n, hp, fp):
    # Per-grid-step VMEM footprint estimate.
    x_buf = 2 * tile_n * hp * 4          # double-buffered f32 input tile
    o_buf = 2 * tile_n * hp * 4          # double-buffered f32 output tile
    w_buf = 2 * hp * fp * 2              # w1 + w2 (bf16), VMEM-resident
    b_buf = 2 * (fp + hp) * 4            # biases (f32)
    h_tmp = 2 * tile_n * fp * 4          # f32 intermediate h (+ GELU temp)
    return x_buf + o_buf + w_buf + b_buf + h_tmp


def _pick_tile_n(n, hp, fp, budget=24 << 20, cap=1024):
    tile = max(8, min(cap, _round_up(n, 8)))
    tile = (tile // 8) * 8
    while tile > 8 and _vmem_bytes(tile, hp, fp) > budget:
        tile = max(8, ((tile // 2) // 8) * 8)
    return tile


def _pad2(a, rows, cols):
    pr, pc = rows - a.shape[0], cols - a.shape[1]
    if pr or pc:
        a = jnp.pad(a, ((0, pr), (0, pc)))
    return a


def residual_mlp_kernel(x_ref, w1_ref, b1_ref, w2_ref, b2_ref, o_ref):
    # x_ref:  [TN, Hp] f32      w1_ref: [Hp, Fp] bf16   b1_ref: [1, Fp] f32
    # w2_ref: [Fp, Hp] bf16     b2_ref: [1, Hp]  f32    o_ref:  [TN, Hp] f32
    x = x_ref[...]                                   # residual kept in f32
    xb = x.astype(jnp.bfloat16)                      # bf16 operand for the MXU

    h = jnp.dot(xb, w1_ref[...], preferred_element_type=jnp.float32)
    h = h + b1_ref[...]                              # f32 bias add (broadcast)
    # TODO(synk): PyTorch nn.GELU defaults to exact erf; the tanh approximation
    # here matches nn.GELU(approximate='tanh') and differs at ~1e-3.
    h = jax.nn.gelu(h, approximate=True)

    y = jnp.dot(h.astype(jnp.bfloat16), w2_ref[...],
                preferred_element_type=jnp.float32)

    # ResidualAdd: out = fn(x) + x   (bias + residual in f32, single store)
    o_ref[...] = (y + b2_ref[...] + x).astype(o_ref.dtype)


def residual_add_mlp(x, w1, b1, w2, b2, *, tile_n=None):
    """out = MLP(x) + x, computed fully inside one Pallas kernel.

    x : [N, H] float32; w1: [H, F]; b1: [1, F]; w2: [F, H]; b2: [1, H].
    """
    N, H = x.shape
    F = w1.shape[1]

    # Lane-dense padding: hidden / ff dims to multiples of 128 (vreg lane width).
    Hp = _round_up(H, 128)
    Fp = _round_up(F, 128)

    if tile_n is None:
        tile_n = _pick_tile_n(N, Hp, Fp)
    Np = _round_up(max(N, tile_n), tile_n)

    # TODO(synk): for very large H (>= ~2048, F = 4H) the bf16 weights no longer
    # both fit VMEM on v7x (64 MiB) -- add an inner "arbitrary" grid axis over F
    # with a (tile_n, Hp) f32 accumulator scratch and pl.when init/finalize.

    xp = _pad2(x.astype(jnp.float32), Np, Hp)
    w1p = _pad2(w1, Hp, Fp).astype(jnp.bfloat16)
    b1p = _pad2(b1.reshape(1, -1), 1, Fp).astype(jnp.float32)
    w2p = _pad2(w2, Fp, Hp).astype(jnp.bfloat16)
    b2p = _pad2(b2.reshape(1, -1), 1, Hp).astype(jnp.float32)

    grid = (Np // tile_n,)
    vmem_limit = int(min(128 << 20,
                         max(32 << 20, int(_vmem_bytes(tile_n, Hp, Fp) * 1.25))))

    cost = pl.CostEstimate(
        flops=4 * Np * Hp * Fp,                       # two matmuls
        transcendentals=Np * Fp,                      # one tanh per GELU element
        bytes_accessed=(Np * Hp * 4                   # x in
                        + 2 * Hp * Fp * 2             # w1 + w2 (bf16)
                        + (Fp + Hp) * 4               # biases
                        + Np * Hp * 4),               # out
    )

    out = pl.pallas_call(
        residual_mlp_kernel,
        out_shape=jax.ShapeDtypeStruct((Np, Hp), jnp.float32),
        grid_spec=pl.GridSpec(
            grid=grid,
            in_specs=[
                pl.BlockSpec((tile_n, Hp), lambda i: (i, 0)),   # x: streamed over N
                pl.BlockSpec((Hp, Fp), lambda i: (0, 0)),       # w1: VMEM-resident
                pl.BlockSpec((1, Fp), lambda i: (0, 0)),        # b1: resident
                pl.BlockSpec((Fp, Hp), lambda i: (0, 0)),       # w2: VMEM-resident
                pl.BlockSpec((1, Hp), lambda i: (0, 0)),        # b2: resident
            ],
            out_specs=pl.BlockSpec((tile_n, Hp), lambda i: (i, 0)),
        ),
        compiler_params=pltpu.CompilerParams(
            dimension_semantics=("parallel",),        # rows independent -> megacore
            vmem_limit_bytes=vmem_limit,
        ),
        cost_estimate=cost,
    )(xp, w1p, b1p, w2p, b2p)

    return out[:N, :H]


if __name__ == "__main__":
    # Small shapes consistent with the module: batch=2, seq=8, hidden=32, expansion=4.
    batch, seq, hidden, expansion = 2, 8, 32, 4
    ff = hidden * expansion  # 128

    key = jax.random.PRNGKey(0)
    kx, k1, k2, k3, k4 = jax.random.split(key, 5)

    x3d = jax.random.normal(kx, (batch, seq, hidden), dtype=jnp.float32)
    x = x3d.reshape(batch * seq, hidden)          # [N, H] layout (glue reshape)

    # Deterministic parameter init (synthetic; no checkpoint load).
    w1 = jax.random.normal(k1, (hidden, ff), dtype=jnp.float32) * 0.02
    b1 = jax.random.normal(k2, (1, ff), dtype=jnp.float32) * 0.01
    w2 = jax.random.normal(k3, (ff, hidden), dtype=jnp.float32) * 0.02
    b2 = jax.random.normal(k4, (1, hidden), dtype=jnp.float32) * 0.01

    out = residual_add_mlp(x, w1, b1, w2, b2)
    out = jax.block_until_ready(out)

    # Pure-JAX reference of ResidualAdd(fn)(x), matching the kernel's
    # bf16-operand / f32-accumulation precision.
    xb = x.astype(jnp.bfloat16)
    w1b = w1.astype(jnp.bfloat16)
    w2b = w2.astype(jnp.bfloat16)
    h_ref = jax.nn.gelu(
        jnp.dot(xb, w1b, preferred_element_type=jnp.float32) + b1,
        approximate=True)
    y_ref = jnp.dot(h_ref.astype(jnp.bfloat16), w2b,
                    preferred_element_type=jnp.float32) + b2
    ref = y_ref + x
    assert jnp.allclose(out, ref, atol=1e-3, rtol=1e-3), "mismatch vs reference"

    # Reshape back to [batch, seq, hidden] (glue only)
    _ = out.reshape(batch, seq, hidden)

    print("KERNEL_OK")
</pallas_src>

<mosaic_0001>
module attributes {stable_mosaic.version = 11 : i64} {
  func.func @residual_mlp_kernel(%arg0: i32, %arg1: memref<16x128xf32, #tpu.memory_space<vmem>>, %arg2: memref<128x128xbf16, #tpu.memory_space<vmem>>, %arg3: memref<1x128xf32, #tpu.memory_space<vmem>>, %arg4: memref<128x128xbf16, #tpu.memory_space<vmem>>, %arg5: memref<1x128xf32, #tpu.memory_space<vmem>>, %arg6: memref<16x128xf32, #tpu.memory_space<vmem>>) attributes {dimension_semantics = [#tpu.dimension_semantics<parallel>], iteration_bounds = array<i64: 1>, scalar_prefetch = 0 : i64, scratch_operands = 0 : i64, tpu.core_type = #tpu.core_type<tc>, window_params = [{transform_indices = @transform_0, window_bounds = array<i64: 16, 128>}, {pipeline_mode = #tpu.pipeline_mode<synchronous>, transform_indices = @transform_1, window_bounds = array<i64: 128, 128>}, {pipeline_mode = #tpu.pipeline_mode<synchronous>, transform_indices = @transform_2, window_bounds = array<i64: 1, 128>}, {pipeline_mode = #tpu.pipeline_mode<synchronous>, transform_indices = @transform_3, window_bounds = array<i64: 128, 128>}, {pipeline_mode = #tpu.pipeline_mode<synchronous>, transform_indices = @transform_4, window_bounds = array<i64: 1, 128>}, {transform_indices = @transform_5, window_bounds = array<i64: 16, 128>}]} {
    %c0 = arith.constant 0 : index
    %c0_0 = arith.constant 0 : index
    %0 = vector.load %arg1[%c0, %c0_0] : memref<16x128xf32, #tpu.memory_space<vmem>>, vector<16x128xf32>
    %1 = arith.truncf %0 : vector<16x128xf32> to vector<16x128xbf16>
    %c0_1 = arith.constant 0 : index
    %c0_2 = arith.constant 0 : index
    %2 = vector.load %arg2[%c0_1, %c0_2] : memref<128x128xbf16, #tpu.memory_space<vmem>>, vector<128x128xbf16>
    %cst = arith.constant dense<0.000000e+00> : vector<16x128xf32>
    %3 = tpu.matmul %1, %2, %cst {dimension_numbers = #tpu.dot_dimension_numbers<[1], [0], [0], [1], [0, 0, 1, 1], [], []>} : vector<16x128xbf16>, vector<128x128xbf16>, vector<16x128xf32> -> vector<16x128xf32>
    %c0_3 = arith.constant 0 : index
    %c0_4 = arith.constant 0 : index
    %4 = vector.load %arg3[%c0_3, %c0_4] : memref<1x128xf32, #tpu.memory_space<vmem>>, vector<1x128xf32>
    %5 = vector.broadcast %4 : vector<1x128xf32> to vector<16x128xf32>
    %6 = arith.addf %3, %5 : vector<16x128xf32>
    %7 = arith.mulf %6, %6 : vector<16x128xf32>
    %8 = arith.mulf %6, %7 : vector<16x128xf32>
    %cst_5 = arith.constant 4.471500e-02 : f32
    %9 = vector.broadcast %cst_5 : f32 to vector<16x128xf32>
    %10 = arith.mulf %9, %8 : vector<16x128xf32>
    %11 = arith.addf %6, %10 : vector<16x128xf32>
    %cst_6 = arith.constant 0.797884583 : f32
    %12 = vector.broadcast %cst_6 : f32 to vector<16x128xf32>
    %13 = arith.mulf %12, %11 : vector<16x128xf32>
    %14 = math.tanh %13 : vector<16x128xf32>
    %cst_7 = arith.constant 1.000000e+00 : f32
    %15 = vector.broadcast %cst_7 : f32 to vector<16x128xf32>
    %16 = arith.addf %15, %14 : vector<16x128xf32>
    %cst_8 = arith.constant 5.000000e-01 : f32
    %17 = vector.broadcast %cst_8 : f32 to vector<16x128xf32>
    %18 = arith.mulf %17, %16 : vector<16x128xf32>
    %19 = arith.mulf %6, %18 : vector<16x128xf32>
    %20 = arith.truncf %19 : vector<16x128xf32> to vector<16x128xbf16>
    %c0_9 = arith.constant 0 : index
    %c0_10 = arith.constant 0 : index
    %21 = vector.load %arg4[%c0_9, %c0_10] : memref<128x128xbf16, #tpu.memory_space<vmem>>, vector<128x128xbf16>
    %cst_11 = arith.constant dense<0.000000e+00> : vector<16x128xf32>
    %22 = tpu.matmul %20, %21, %cst_11 {dimension_numbers = #tpu.dot_dimension_numbers<[1], [0], [0], [1], [0, 0, 1, 1], [], []>} : vector<16x128xbf16>, vector<128x128xbf16>, vector<16x128xf32> -> vector<16x128xf32>
    %c0_12 = arith.constant 0 : index
    %c0_13 = arith.constant 0 : index
    %23 = vector.load %arg5[%c0_12, %c0_13] : memref<1x128xf32, #tpu.memory_space<vmem>>, vector<1x128xf32>
    %24 = vector.broadcast %23 : vector<1x128xf32> to vector<16x128xf32>
    %25 = arith.addf %22, %24 : vector<16x128xf32>
    %26 = arith.addf %25, %0 : vector<16x128xf32>
    %c0_14 = arith.constant 0 : index
    %c0_15 = arith.constant 0 : index
    %27 = vector.load %arg6[%c0_14, %c0_15] : memref<16x128xf32, #tpu.memory_space<vmem>>, vector<16x128xf32>
    tpu.vector_store %arg6[%c0_14, %c0_15], %26 {strides = array<i32>} : memref<16x128xf32, #tpu.memory_space<vmem>>, vector<16x128xf32>,
    return
  }
  func.func @transform_0(%arg0: i32) -> (i32, i32) {
    %c0_i32 = arith.constant 0 : i32
    %c0_i32_0 = arith.constant 0 : i32
    return %arg0, %c0_i32 : i32, i32
  }
  func.func @transform_1(%arg0: i32) -> (i32, i32) {
    %c0_i32 = arith.constant 0 : i32
    %c0_i32_0 = arith.constant 0 : i32
    %c0_i32_1 = arith.constant 0 : i32
    return %c0_i32, %c0_i32_0 : i32, i32
  }
  func.func @transform_2(%arg0: i32) -> (i32, i32) {
    %c0_i32 = arith.constant 0 : i32
    %c0_i32_0 = arith.constant 0 : i32
    %c0_i32_1 = arith.constant 0 : i32
    return %c0_i32, %c0_i32_0 : i32, i32
  }
  func.func @transform_3(%arg0: i32) -> (i32, i32) {
    %c0_i32 = arith.constant 0 : i32
    %c0_i32_0 = arith.constant 0 : i32
    %c0_i32_1 = arith.constant 0 : i32
    return %c0_i32, %c0_i32_0 : i32, i32
  }
  func.func @transform_4(%arg0: i32) -> (i32, i32) {
    %c0_i32 = arith.constant 0 : i32
    %c0_i32_0 = arith.constant 0 : i32
    %c0_i32_1 = arith.constant 0 : i32
    return %c0_i32, %c0_i32_0 : i32, i32
  }
  func.func @transform_5(%arg0: i32) -> (i32, i32) {
    %c0_i32 = arith.constant 0 : i32
    %c0_i32_0 = arith.constant 0 : i32
    return %arg0, %c0_i32 : i32, i32
  }
}

</mosaic_0001>

<bundles_post_ra>
// kernel: tpu_custom_call.1
= control target key start
LH: loop header
LB: loop body
LE: loop exit
PB: predicated region body
PF: predicated region fallthrough
CT: control target
= control target key end

     0   :  { %10 = vsyncpa [#allocation3], 0  ;;  %s591_s0 = inlined_call_operand.hbm [shape: f32[16,128], index: 0, kind: input, shape index: {}]   ;;  %s592_s1 = inlined_call_operand.hbm [shape: bf16[128,128], index: 1, kind: input, shape index: {}]   ;;  %s593_s2 = inlined_call_operand.vmem [shape: f32[1,128], index: 2, kind: input, shape index: {}]   ;;  %s594_s3 = inlined_call_operand.hbm [shape: bf16[128,128], index: 3, kind: input, shape index: {}]   ;;  %s595_s4 = inlined_call_operand.vmem [shape: f32[1,128], index: 4, kind: input, shape index: {}]   ;;  %s596_s5 = inlined_call_operand.hbm [shape: f32[16,128], index: 5, kind: output, shape index: {}]  }
   0x1   :  { %11 = vsyncpa [#allocation6], 0 }
   0x2   :  { %12 = vsyncpa [#allocation4], 0  ;;  %s523_s18 = smov [#allocation5]  }
   0x3   :  { %s30_s19 = sshll.u32 %s523_s18, 4  ;;  %s31_s19 = int_to_ptr.vmem [resolvable:$true] %s30_s19 }
   0x4   :  { %s445_s20 = scalar_lea.vmem %s31_s19, 1024  ;;  %p450_p1 = scmp.lt.s32.totalorder %s31_s19, %s31_s19 }
   0x5   :  { %p446_p0 = scmp.ne.s32.totalorder %s31_s19, %s445_s20  ;;  %p451_p2 = scmp.lt.s32.totalorder %s445_s20, %s445_s20 }
   0x7   :  { %p452_p3 = por %p451_p2, %p450_p1 }
   0x9   :  { %p453_p4 = pnand %p452_p3, %p446_p0 }
   0xb   :  { %456 = shalt.err (!%p453_p4)
}
   0xc   :  { %s524_s21 = smov 64   ;;  %s525_s22 = smov 4  }
   0xd   :  { %36 = dma.hbm_to_vmem [thread:$0]  %s592_s1, 1024, %s31_s19, [#allocation6], %s524_s21, %s524_s21, %s525_s22  }
   0xe   :  { %s526_s25 = smov [#allocation2]  }
   0xf   :  { %s18_s26 = sshll.u32 %s526_s25, 4  ;;  %s19_s26 = int_to_ptr.vmem [resolvable:$true] %s18_s26 }
  0x10   :  { %s465_s27 = scalar_lea.vmem %s19_s26, 256  ;;  %p470_p6 = scmp.lt.s32.totalorder %s19_s26, %s19_s26 }
  0x11   :  { %p466_p5 = scmp.ne.s32.totalorder %s19_s26, %s465_s27  ;;  %p471_p7 = scmp.lt.s32.totalorder %s465_s27, %s465_s27 }
  0x13   :  { %p472_p8 = por %p471_p7, %p470_p6 }
  0x15   :  { %p473_p9 = pnand %p472_p8, %p466_p5 }
  0x17   :  { %476 = shalt.err (!%p473_p9)
}
  0x18   :  { %s527_s28 = smov 128   ;;  %s528_s29 = smov 8  }
  0x19   :  { %24 = dma.hbm_to_vmem [thread:$0]  %s591_s0, 256, %s19_s26, [#allocation3], %s527_s28, %s527_s28, %s528_s29  }
  0x1a   :  { %s529_s1 = smov [#allocation7]  }
  0x1b   :  { %s44_s7 = sshll.u32 %s529_s1, 4  ;;  %s45_s7 = int_to_ptr.vmem [resolvable:$true] %s44_s7 }
  0x1c   :  { %s485_s8 = scalar_lea.vmem %s45_s7, 1024  ;;  %p490_p11 = scmp.lt.s32.totalorder %s45_s7, %s45_s7 }
  0x1d   :  { %p486_p10 = scmp.ne.s32.totalorder %s45_s7, %s485_s8  ;;  %p491_p12 = scmp.lt.s32.totalorder %s485_s8, %s485_s8 }
  0x1f   :  { %p492_p13 = por %p491_p12, %p490_p11 }
  0x21   :  { %p493_p0 = pnand %p492_p13, %p486_p10 }
  0x23   :  { %496 = shalt.err (!%p493_p0)
}
  0x24   :  { %50 = dma.hbm_to_vmem [thread:$0]  %s594_s3, 1024, %s45_s7, [#allocation6], %s524_s21, %s524_s21, %s525_s22  }
  0x25   :  { %517 = dma.done.wait [#allocation3], 256  }
  0x26   :  { %518 = vsyncadd [#allocation3], 4294967040 }
  0x27   :  { %519 = dma.done.wait [#allocation6], 2048  }
  0x28   :  { %520 = vsyncadd [#allocation6], 4294965248  ;;  %v530_v0 = vmov 0.0   ;;  %vm531_vm0 = vmmov 0   ;;  %v417_v1 = vld [vmem:[#allocation5 + $0x38] sm:$0xff]   ;;  %v418_v2 = vld [vmem:[#allocation5 + $0x30] sm:$0xff]  }
  0x29   :  { %367 = vmatprep.subr.bf16.mxu0 %v530_v0  ;;  %383 = vmatprep.mubr.msk.bf16.mxu0 %vm531_vm0, %v530_v0  ;;  %v419_v3 = vld [vmem:[#allocation5 + $0x28] sm:$0xff]   ;;  %v420_v4 = vld [vmem:[#allocation5 + $0x20] sm:$0xff]   ;;  %v421_v5 = vld [vmem:[#allocation5 + $0x18] sm:$0xff]   ;;  %s532_s12 = smov [#allocation8]  }
  0x2a   :  { %387 = vmatprep.subr.bf16.mxu1 %v530_v0  ;;  %403 = vmatprep.mubr.msk.bf16.mxu1 %vm531_vm0, %v530_v0  ;;  %v422_v6 = vld [vmem:[#allocation5 + $0x10] sm:$0xff]   ;;  %v423_v7 = vld [vmem:[#allocation5 + $0x8] sm:$0xff]   ;;  %v424_v8 = vld [vmem:[#allocation5] sm:$0xff]   ;;  %s318_s13 = sshll.u32 %s532_s12, 4  ;;  %s319_s13 = int_to_ptr.vmem [resolvable:$true] %s318_s13 }
  0x2b   :  { %368 = vmatpush3.bf16.msra.mxu0 %v417_v1  ;;  %v63_v9 = vld [vmem:[#allocation2] sm:$0xff]  ;;  %v575_v10 = vld [vmem:[#allocation2 + $0x8] sm:$0xff]  ;;  %v427_v14 = vld [vmem:[#allocation7 + $0x28] sm:$0xff]   ;;  %s497_s14 = scalar_lea.vmem %s319_s13, 256  ;;  %p502_p2 = scmp.lt.s32.totalorder %s319_s13, %s319_s13 }
  0x2c   :  { %369 = vmatprep.subr.bf16.mxu0 %v530_v0  ;;  %v65_v11 = vpack.c.bf16 %v575_v10, %v63_v9  ;;  %v425_v12 = vld [vmem:[#allocation7 + $0x38] sm:$0xff]   ;;  %v426_v13 = vld [vmem:[#allocation7 + $0x30] sm:$0xff]   ;;  %v428_v15 = vld [vmem:[#allocation7 + $0x20] sm:$0xff]   ;;  %p498_p1 = scmp.ne.s32.totalorder %s319_s13, %s497_s14  ;;  %p503_p3 = scmp.lt.s32.totalorder %s497_s14, %s497_s14 }
  0x2d   :  { %388 = vmatpush3.bf16.msra.mxu1 %v425_v12  ;;  %v429_v16 = vld [vmem:[#allocation7 + $0x18] sm:$0xff]   ;;  %v430_v17 = vld [vmem:[#allocation7 + $0x10] sm:$0xff]   ;;  %v431_v18 = vld [vmem:[#allocation7 + $0x8] sm:$0xff]  }
  0x2e   :  { %389 = vmatprep.subr.bf16.mxu1 %v530_v0  ;;  %v432_v19 = vld [vmem:[#allocation7] sm:$0xff]   ;;  %v331_v20 = vld [vmem:[%s593_s2] ss:$0 sm:$0xff]  ;;  %p504_p4 = por %p503_p3, %p502_p2 }
  0x2f   :  { %370 = vmatpush3.bf16.msra.mxu0 %v418_v2  ;;  %v340_v46 = vld [vmem:[%s595_s4] ss:$0 sm:$0xff] }
  0x30   :  { %371 = vmatprep.subr.bf16.mxu0 %v530_v0  ;;  %p505_p5 = pnand %p504_p4, %p498_p1 }
  0x31   :  { %390 = vmatpush3.bf16.msra.mxu1 %v426_v13 }
  0x32   :  { %391 = vmatprep.subr.bf16.mxu1 %v530_v0 }
  0x33   :  { %372 = vmatpush3.bf16.msra.mxu0 %v419_v3 }
  0x34   :  { %373 = vmatprep.subr.bf16.mxu0 %v530_v0 }
  0x35   :  { %392 = vmatpush3.bf16.msra.mxu1 %v427_v14 }
  0x36   :  { %393 = vmatprep.subr.bf16.mxu1 %v530_v0 }
  0x37   :  { %374 = vmatpush3.bf16.msra.mxu0 %v420_v4 }
  0x38   :  { %375 = vmatprep.subr.bf16.mxu0 %v530_v0 }
  0x39   :  { %394 = vmatpush3.bf16.msra.mxu1 %v428_v15 }
  0x3a   :  { %395 = vmatprep.subr.bf16.mxu1 %v530_v0 }
  0x3b   :  { %376 = vmatpush3.bf16.msra.mxu0 %v421_v5 }
  0x3c   :  { %377 = vmatprep.subr.bf16.mxu0 %v530_v0 }
  0x3d   :  { %396 = vmatpush3.bf16.msra.mxu1 %v429_v16 }
  0x3e   :  { %397 = vmatprep.subr.bf16.mxu1 %v530_v0 }
  0x3f   :  { %378 = vmatpush3.bf16.msra.mxu0 %v422_v6 }
  0x40   :  { %379 = vmatprep.subr.bf16.mxu0 %v530_v0 }
  0x41   :  { %398 = vmatpush3.bf16.msra.mxu1 %v430_v17 }
  0x42   :  { %399 = vmatprep.subr.bf16.mxu1 %v530_v0 }
  0x43   :  { %380 = vmatpush3.bf16.msra.mxu0 %v423_v7 }
  0x44   :  { %381 = vmatprep.subr.bf16.mxu0 %v530_v0 }
  0x45   :  { %400 = vmatpush3.bf16.msra.mxu1 %v431_v18 }
  0x46   :  { %401 = vmatprep.subr.bf16.mxu1 %v530_v0 }
  0x47   :  { %382 = vmatpush3.bf16.msra.mxu0 %v424_v8 }
  0x49   :  { %402 = vmatpush3.bf16.msra.mxu1 %v432_v19 }
  0x4a   :  { %384 = vmatmul.mubr.bf16.vlgmr.msra.gmra.mxu0 %v65_v11 }
 0x10a   :  { %v171_v21 = vpop.f32.mrf.mxu0 }
 0x10b   :  { %v172_v22 = vadd.f32 %v331_v20, %v171_v21 }
 0x10c   :  { %v385_v23 = vpop.f32.mrf.mxu0 }
 0x10d   :  { %v178_v24 = vmul.f32 %v172_v22, %v172_v22 }
 0x10e   :  { %v174_v25 = vpop.f32.mrf.mxu0 }
 0x10f   :  { %v180_v26 = vmul.f32 %v178_v24, %v172_v22  ;;  %v175_v27 = vadd.f32 %v331_v20, %v174_v25 }
 0x110   :  { %v386_v28 = vpop.f32.mrf.mxu0 }
 0x111   :  { %v182_v29 = vmul.f32 0.044715, %v180_v26  ;;  %v179_v30 = vmul.f32 %v175_v27, %v175_v27 }
 0x113   :  { %v184_v31 = vadd.f32 %v182_v29, %v172_v22  ;;  %v181_v32 = vmul.f32 %v179_v30, %v175_v27 }
 0x115   :  { %v186_v33 = vmul.f32 0.7978846, %v184_v31  ;;  %v183_v34 = vmul.f32 0.044715, %v181_v32 }
 0x117   :  { %433 = vtanh.f32 %v186_v33  ;;  %v185_v35 = vadd.f32 %v183_v34, %v175_v27 }
 0x119   :  { %v187_v36 = vmul.f32 0.7978846, %v185_v35 }
 0x11b   :  { %435 = vtanh.f32 %v187_v36 }
 0x124   :  { %v434_v37 = vpop.eup %433 }
 0x125   :  { %v190_v38 = vadd.f32 1.0, %v434_v37 }
 0x127   :  { %v192_v41 = vmul.f32 0.5, %v190_v38 }
 0x128   :  { %v436_v39 = vpop.eup %435 }
 0x129   :  { %v191_v40 = vadd.f32 1.0, %v436_v39  ;;  %v194_v43 = vmul.f32 %v192_v41, %v172_v22 }
 0x12b   :  { %v193_v42 = vmul.f32 0.5, %v191_v40 }
 0x12d   :  { %v195_v44 = vmul.f32 %v193_v42, %v175_v27 }
 0x12f   :  { %v196_v45 = vpack.c.bf16 %v195_v44, %v194_v43 }
 0x131   :  { %404 = vmatmul.mubr.bf16.vlgmr.msra.gmra.mxu1 %v196_v45 }
 0x1f1   :  { %v302_v47 = vpop.f32.mrf.mxu1 }
 0x1f2   :  { %v303_v48 = vadd.f32 %v340_v46, %v302_v47 }
 0x1f3   :  { %v405_v49 = vpop.f32.mrf.mxu1 }
 0x1f4   :  { %v309_v50 = vadd.f32 %v303_v48, %v63_v9 }
 0x1f5   :  { %v305_v51 = vpop.f32.mrf.mxu1 }
 0x1f6   :  { %311 = vst [vmem:[#allocation8] sm:$0xff] %v309_v50  ;;  %v306_v52 = vadd.f32 %v340_v46, %v305_v51 }
 0x1f7   :  { %v406_v53 = vpop.f32.mrf.mxu1 }
 0x1f8   :  { %v310_v54 = vadd.f32 %v306_v52, %v575_v10 }
 0x1fa   :  { %312 = vst [vmem:[#allocation8 + $0x8] sm:$0xff] %v310_v54 }
 0x1fb   :  { %508 = shalt.err (!%p505_p5)
}
 0x1fc   :  { %324 = dma.vmem_to_hbm [thread:$0]  %s319_s13, 256, %s596_s5, [#allocation4], %s527_s28, %s527_s28, %s528_s29  }
 0x1fd   :  { %521 = dma.done.wait [#allocation4], 256  }
 0x1fe   :  { %522 = vsyncadd [#allocation4], 4294967040 }
 0x1ff   :  { %328 = vsyncpa [#allocation3], 1 }
 0x200   :  { %329 = vsyncpa [#allocation6], 1 }
 0x201   :  { %330 = vsyncpa [#allocation4], 1 }

</bundles_post_ra>
